<compile_context>
chip_gen: v6e
topology: v6e:2x2x1
jax: 0.10.0
libtpu: 0.0.40
codegen_flags: <defaults>
</compile_context>

<pallas_src>
import functools

import jax
import jax.numpy as jnp
from jax.experimental import pallas as pl
from jax.experimental.pallas import tpu as pltpu

LANE = 128  # lane-padded width for the class dimension (unmasked vst)


# --------------------------------- kernels --------------------------------- #

def gcn_fused_kernel(a_ref, xw1_ref, b1_ref, w2p_ref, b2p_ref, o_ref, z_ref):
    """Whole forward with A resident in VMEM (read once).

      z = relu(A @ XW1 + b1) @ W2_pad      (bf16, kept in a VMEM scratch)
      o = A @ z + b2_pad                   (f32, lane-padded)
    """
    neigh = jnp.dot(a_ref[...], xw1_ref[...], preferred_element_type=jnp.float32)
    h1 = jnp.maximum(neigh + b1_ref[...], 0.0)            # conv1 + ReLU (dropout = identity)
    z_ref[...] = jnp.dot(h1.astype(jnp.bfloat16), w2p_ref[...],
                         preferred_element_type=jnp.float32).astype(jnp.bfloat16)
    o_ref[...] = (jnp.dot(a_ref[...], z_ref[...], preferred_element_type=jnp.float32)
                  + b2p_ref[...])


def gcn_layer1_kernel(a_ref, xw1_ref, b1_ref, w2p_ref, z_ref, acc_ref):
    """Row slab i, contraction block k:  acc += A[i,k] @ XW1[k];
    on the last k:  z[i] = relu(acc + b1) @ W2_pad  (bf16 out)."""
    k = pl.program_id(1)

    @pl.when(k == 0)
    def _():
        acc_ref[...] = jnp.zeros_like(acc_ref)

    acc_ref[...] += jnp.dot(a_ref[...], xw1_ref[...], preferred_element_type=jnp.float32)

    @pl.when(k == pl.num_programs(1) - 1)
    def _():
        h1 = jnp.maximum(acc_ref[...] + b1_ref[...], 0.0)  # ReLU; dropout = identity (eval)
        z_ref[...] = jnp.dot(h1.astype(jnp.bfloat16), w2p_ref[...],
                             preferred_element_type=jnp.float32).astype(jnp.bfloat16)


def gcn_layer2_kernel(a_ref, z_ref, b2p_ref, o_ref, acc_ref):
    """Row slab i, contraction block k:  acc += A[i,k] @ z[k];
    on the last k:  out[i] = acc + b2_pad  (f32, lane-padded)."""
    k = pl.program_id(1)

    @pl.when(k == 0)
    def _():
        acc_ref[...] = jnp.zeros_like(acc_ref)

    acc_ref[...] += jnp.dot(a_ref[...], z_ref[...], preferred_element_type=jnp.float32)

    @pl.when(k == pl.num_programs(1) - 1)
    def _():
        o_ref[...] = acc_ref[...] + b2p_ref[...]


# --------------------------------- wrapper ---------------------------------- #

def _round_up(x, m):
    return -(-x // m) * m


def _vmem_budget_bytes():
    """Per-core VMEM budget with headroom (64 MiB on v7x, 128 MiB on v5e/v6e)."""
    cap = 64 * 1024 * 1024
    try:
        cap = int(getattr(pltpu.get_tpu_info(), "vmem_capacity_bytes", cap))
    except Exception:
        pass
    return min(int(cap * 0.85), 112 * 1024 * 1024)


def _spec(shape, index_map, single_buffer=False):
    """BlockSpec; constant-index resident blocks can be single-buffered (halves VMEM)."""
    if single_buffer:
        return pl.BlockSpec(shape, index_map, pipeline_mode=pl.Buffered(1))
    return pl.BlockSpec(shape, index_map)


def _pick_tile(n):
    """Square A tile: multiple of 128 (lane dim of the A block), big enough to amortize the
    ~0.35us/grid-step overhead, small enough to keep >=2 row programs for v7x's two TCs."""
    t = 512 if n >= 4096 else (256 if n >= 1024 else 128)
    while t > 128 and _round_up(n, t) // t < 2:
        t //= 2
    return t


def _fused_forward(a_bf, xw1_bf, b1, w2p, b2p, c, vmem_budget, single_buffer):
    n = a_bf.shape[0]
    h = xw1_bf.shape[1]
    cost = pl.CostEstimate(
        flops=2 * n * n * h + 2 * n * h * LANE + 2 * n * n * LANE,
        transcendentals=0,
        bytes_accessed=(a_bf.size + xw1_bf.size + w2p.size) * 2
                       + (b1.size + b2p.size) * 4 + n * LANE * 4)
    out_pad = pl.pallas_call(
        gcn_fused_kernel,
        out_shape=jax.ShapeDtypeStruct((n, LANE), jnp.float32),
        grid=(1,),
        in_specs=[
            _spec((n, n), lambda i: (0, 0), single_buffer),        # A (resident, read once)
            _spec((n, h), lambda i: (0, 0), single_buffer),        # XW1
            _spec((1, h), lambda i: (0, 0), single_buffer),        # b1
            _spec((h, LANE), lambda i: (0, 0), single_buffer),     # W2 (class-padded)
            _spec((1, LANE), lambda i: (0, 0), single_buffer),     # b2 (class-padded)
        ],
        out_specs=pl.BlockSpec((n, LANE), lambda i: (0, 0)),
        scratch_shapes=[pltpu.VMEM((n, LANE), jnp.bfloat16)],      # z kept on-chip
        compiler_params=pltpu.CompilerParams(
            dimension_semantics=("arbitrary",),
            vmem_limit_bytes=vmem_budget),
        cost_estimate=cost,
    )(a_bf, xw1_bf, b1, w2p, b2p)
    return out_pad[:, :c]


def _tiled_forward(a_bf, xw1_bf, b1, w2p, b2p, c, vmem_budget, single_buffer):
    n = a_bf.shape[0]
    h = xw1_bf.shape[1]
    t = _pick_tile(n)
    n_pad = _round_up(n, t)
    if n_pad != n:  # zero rows/cols contribute nothing to the aggregation (exact)
        a_p = jnp.zeros((n_pad, n_pad), jnp.bfloat16).at[:n, :n].set(a_bf)
        xw1_p = jnp.zeros((n_pad, h), jnp.bfloat16).at[:n, :].set(xw1_bf)
    else:
        a_p, xw1_p = a_bf, xw1_bf

    grid = (n_pad // t, n_pad // t)        # (row slabs, contraction blocks) — reduction last
    cparams = pltpu.CompilerParams(
        dimension_semantics=("parallel", "arbitrary"),
        vmem_limit_bytes=vmem_budget)

    cost1 = pl.CostEstimate(
        flops=2 * n_pad * n_pad * h + 2 * n_pad * h * LANE,
        transcendentals=0,
        bytes_accessed=(a_p.size + xw1_p.size + w2p.size + n_pad * LANE) * 2 + b1.size * 4)
    z = pl.pallas_call(
        gcn_layer1_kernel,
        out_shape=jax.ShapeDtypeStruct((n_pad, LANE), jnp.bfloat16),
        grid=grid,
        in_specs=[
            pl.BlockSpec((t, t), lambda i, k: (i, k)),             # A block (streamed)
            pl.BlockSpec((t, h), lambda i, k: (k, 0)),             # XW1 contraction slice
            _spec((1, h), lambda i, k: (0, 0), single_buffer),     # b1
            _spec((h, LANE), lambda i, k: (0, 0), single_buffer),  # W2 (class-padded)
        ],
        out_specs=pl.BlockSpec((t, LANE), lambda i, k: (i, 0)),
        scratch_shapes=[pltpu.VMEM((t, h), jnp.float32)],
        compiler_params=cparams,
        cost_estimate=cost1,
    )(a_p, xw1_p, b1, w2p)

    cost2 = pl.CostEstimate(
        flops=2 * n_pad * n_pad * LANE,
        transcendentals=0,
        bytes_accessed=(a_p.size + z.size) * 2 + b2p.size * 4 + n_pad * LANE * 4)
    out_pad = pl.pallas_call(
        gcn_layer2_kernel,
        out_shape=jax.ShapeDtypeStruct((n_pad, LANE), jnp.float32),
        grid=grid,
        in_specs=[
            pl.BlockSpec((t, t), lambda i, k: (i, k)),              # A block (streamed)
            pl.BlockSpec((t, LANE), lambda i, k: (k, 0)),           # z contraction slice
            _spec((1, LANE), lambda i, k: (0, 0), single_buffer),   # b2 (class-padded)
        ],
        out_specs=pl.BlockSpec((t, LANE), lambda i, k: (i, 0)),
        scratch_shapes=[pltpu.VMEM((t, LANE), jnp.float32)],
        compiler_params=cparams,
        cost_estimate=cost2,
    )(a_p, z, b2p)
    return out_pad[:n, :c]


def simple_gcn_forward(a_norm, x, params, *, force_tiled=False):
    """out = A_norm @ relu(A_norm @ X @ W1 + b1) @ W2 + b2   (dropout = identity, eval)."""
    n, _ = x.shape
    h = params["w1"].shape[1]
    c = params["w2"].shape[1]
    vmem_budget = _vmem_budget_bytes()

    # bf16 kernel operands, f32 MXU accumulation inside the kernels.
    a_bf = a_norm.astype(jnp.bfloat16)
    # Precompute XW1 = X @ W1 (trivial (N,D)x(D,H)) so the kernels only do A-aggregations.
    xw1_bf = (x.astype(jnp.float32) @ params["w1"].astype(jnp.float32)).astype(jnp.bfloat16)
    b1 = params["b1"].astype(jnp.float32).reshape(1, h)
    # Lane-dense padding of the class dim (c -> 128): zero columns are free on the MXU and
    # give unmasked stores; sliced back off in the wrapper.
    w2p = jnp.zeros((h, LANE), jnp.bfloat16).at[:, :c].set(params["w2"].astype(jnp.bfloat16))
    b2p = jnp.zeros((1, LANE), jnp.float32).at[:, :c].set(
        params["b2"].astype(jnp.float32).reshape(1, c))

    # Fused path whenever A + activations fit resident in VMEM: both layers are HBM-bound on
    # streaming A, so reading it once (and keeping z on-chip) is the dominant win.
    fused_bytes = (n * n * 2 + n * h * 2 + n * LANE * 2       # A, XW1, z scratch (1x each)
                   + 2 * n * LANE * 4                         # output (assume 2 buffers)
                   + h * LANE * 2 + (h + LANE) * 4)           # weights / biases
    if force_tiled or fused_bytes > vmem_budget:
        path = functools.partial(_tiled_forward, a_bf, xw1_bf, b1, w2p, b2p, c, vmem_budget)
    else:
        path = functools.partial(_fused_forward, a_bf, xw1_bf, b1, w2p, b2p, c, vmem_budget)

    try:
        return path(single_buffer=True)
    except Exception:
        # TODO(synk): pipeline_mode=pl.Buffered(1) unsupported on this jax version — fall
        # back to default double-buffering of the constant-index resident blocks.
        return path(single_buffer=False)


# ----------------------- graph construction & reference --------------------- #

def build_norm_adj(src, dst, num_nodes):
    """Dense A_hat = A + I with DGL GraphConv norm='both' scaling D_in^{-1/2} A_hat D_out^{-1/2}.
    (Duplicate edges collapse in the dense adjacency.)"""
    a = jnp.zeros((num_nodes, num_nodes), jnp.float32)
    a = a.at[dst, src].set(1.0)                      # message src -> dst; row = destination
    a = jnp.minimum(a + jnp.eye(num_nodes, dtype=jnp.float32), 1.0)
    deg_in = jnp.sum(a, axis=1)                      # in-degree  (rows = destinations)
    deg_out = jnp.sum(a, axis=0)                     # out-degree (cols = sources)
    return (a * (1.0 / jnp.sqrt(jnp.maximum(deg_in, 1.0)))[:, None]
              * (1.0 / jnp.sqrt(jnp.maximum(deg_out, 1.0)))[None, :])


def reference_forward(a_norm, x, params):
    """Pure-JAX reference mirroring the kernels' bf16 quantization points (f32 math)."""
    q = lambda v: v.astype(jnp.bfloat16).astype(jnp.float32)
    a = q(a_norm)
    xw1 = q(x.astype(jnp.float32) @ params["w1"].astype(jnp.float32))
    b1 = params["b1"].astype(jnp.float32).reshape(1, -1)
    b2 = params["b2"].astype(jnp.float32).reshape(1, -1)
    h1 = jnp.maximum(a @ xw1 + b1, 0.0)              # conv1 + ReLU (dropout = identity)
    z = q(q(h1) @ q(params["w2"]))                   # reordered conv2: (h1 @ W2) first
    return a @ z + b2


# ---------------------------------- main ------------------------------------ #

if __name__ == "__main__":
    INPUT_DIM, HIDDEN_DIM, NUM_CLASSES = 32, 32, 8

    def build_case(key, n, num_edges):
        k_feat, k_edge, k1, k2, kb1, kb2 = jax.random.split(key, 6)
        src = jax.random.randint(k_edge, (num_edges,), 0, n)
        dst = jax.random.randint(jax.random.fold_in(k_edge, 1), (num_edges,), 0, n)
        a_norm = build_norm_adj(src, dst, n)
        x = jax.random.normal(k_feat, (n, INPUT_DIM), jnp.float32)
        params = {
            "w1": 0.1 * jax.random.normal(k1, (INPUT_DIM, HIDDEN_DIM), jnp.float32),
            "b1": 0.05 * jax.random.normal(kb1, (HIDDEN_DIM,), jnp.float32),
            "w2": 0.1 * jax.random.normal(k2, (HIDDEN_DIM, NUM_CLASSES), jnp.float32),
            "b2": 0.05 * jax.random.normal(kb2, (NUM_CLASSES,), jnp.float32),
        }
        return a_norm, x, params

    key = jax.random.PRNGKey(0)

    # Case 1: small graph -> fused single-call fast path (A resident, read once, grid=(1,)).
    a1, x1, p1 = build_case(key, 64, 256)
    out1 = jax.block_until_ready(simple_gcn_forward(a1, x1, p1))
    ref1 = reference_forward(a1, x1, p1)
    assert out1.shape == (64, NUM_CLASSES)
    assert jnp.allclose(out1, ref1, atol=5e-3, rtol=5e-3), "fused path mismatch vs reference"

    # Case 2: exercise the tiled (row-parallel x contraction) path incl. padding 200 -> 256.
    a2, x2, p2 = build_case(jax.random.fold_in(key, 1), 200, 800)
    out2 = jax.block_until_ready(simple_gcn_forward(a2, x2, p2, force_tiled=True))
    ref2 = reference_forward(a2, x2, p2)
    assert out2.shape == (200, NUM_CLASSES)
    assert jnp.allclose(out2, ref2, atol=5e-3, rtol=5e-3), "tiled path mismatch vs reference"

    print("KERNEL_OK")
</pallas_src>

<mosaic_0001>
module attributes {stable_mosaic.version = 11 : i64} {
  func.func @gcn_fused_kernel(%arg0: i32, %arg1: memref<64x64xbf16, #tpu.memory_space<vmem>>, %arg2: memref<64x32xbf16, #tpu.memory_space<vmem>>, %arg3: memref<1x32xf32, #tpu.memory_space<vmem>>, %arg4: memref<32x128xbf16, #tpu.memory_space<vmem>>, %arg5: memref<1x128xf32, #tpu.memory_space<vmem>>, %arg6: memref<64x128xf32, #tpu.memory_space<vmem>>, %arg7: memref<64x128xbf16, #tpu.memory_space<vmem>>) attributes {dimension_semantics = [#tpu.dimension_semantics<arbitrary>], iteration_bounds = array<i64: 1>, scalar_prefetch = 0 : i64, scratch_operands = 1 : i64, tpu.core_type = #tpu.core_type<tc>, window_params = [{pipeline_mode = #tpu.pipeline_mode<synchronous>, transform_indices = @transform_0, window_bounds = array<i64: 64, 64>}, {pipeline_mode = #tpu.pipeline_mode<synchronous>, transform_indices = @transform_1, window_bounds = array<i64: 64, 32>}, {pipeline_mode = #tpu.pipeline_mode<synchronous>, transform_indices = @transform_2, window_bounds = array<i64: 1, 32>}, {pipeline_mode = #tpu.pipeline_mode<synchronous>, transform_indices = @transform_3, window_bounds = array<i64: 32, 128>}, {pipeline_mode = #tpu.pipeline_mode<synchronous>, transform_indices = @transform_4, window_bounds = array<i64: 1, 128>}, {pipeline_mode = #tpu.pipeline_mode<synchronous>, transform_indices = @transform_5, window_bounds = array<i64: 64, 128>}]} {
    %c0 = arith.constant 0 : index
    %c0_0 = arith.constant 0 : index
    %0 = vector.load %arg1[%c0, %c0_0] : memref<64x64xbf16, #tpu.memory_space<vmem>>, vector<64x64xbf16>
    %c0_1 = arith.constant 0 : index
    %c0_2 = arith.constant 0 : index
    %1 = vector.load %arg2[%c0_1, %c0_2] : memref<64x32xbf16, #tpu.memory_space<vmem>>, vector<64x32xbf16>
    %cst = arith.constant dense<0.000000e+00> : vector<64x32xf32>
    %2 = tpu.matmul %0, %1, %cst {dimension_numbers = #tpu.dot_dimension_numbers<[1], [0], [0], [1], [0, 0, 1, 1], [], []>} : vector<64x64xbf16>, vector<64x32xbf16>, vector<64x32xf32> -> vector<64x32xf32>
    %c0_3 = arith.constant 0 : index
    %c0_4 = arith.constant 0 : index
    %3 = vector.load %arg3[%c0_3, %c0_4] : memref<1x32xf32, #tpu.memory_space<vmem>>, vector<1x32xf32>
    %4 = vector.broadcast %3 : vector<1x32xf32> to vector<64x32xf32>
    %5 = arith.addf %2, %4 : vector<64x32xf32>
    %cst_5 = arith.constant 0.000000e+00 : f32
    %6 = vector.broadcast %cst_5 : f32 to vector<64x32xf32>
    %7 = arith.maximumf %5, %6 : vector<64x32xf32>
    %8 = arith.truncf %7 : vector<64x32xf32> to vector<64x32xbf16>
    %c0_6 = arith.constant 0 : index
    %c0_7 = arith.constant 0 : index
    %9 = vector.load %arg4[%c0_6, %c0_7] : memref<32x128xbf16, #tpu.memory_space<vmem>>, vector<32x128xbf16>
    %cst_8 = arith.constant dense<0.000000e+00> : vector<64x128xf32>
    %10 = tpu.matmul %8, %9, %cst_8 {dimension_numbers = #tpu.dot_dimension_numbers<[1], [0], [0], [1], [0, 0, 1, 1], [], []>} : vector<64x32xbf16>, vector<32x128xbf16>, vector<64x128xf32> -> vector<64x128xf32>
    %11 = arith.truncf %10 : vector<64x128xf32> to vector<64x128xbf16>
    %c0_9 = arith.constant 0 : index
    %c0_10 = arith.constant 0 : index
    %12 = vector.load %arg7[%c0_9, %c0_10] : memref<64x128xbf16, #tpu.memory_space<vmem>>, vector<64x128xbf16>
    tpu.vector_store %arg7[%c0_9, %c0_10], %11 {strides = array<i32>} : memref<64x128xbf16, #tpu.memory_space<vmem>>, vector<64x128xbf16>,
    %c0_11 = arith.constant 0 : index
    %c0_12 = arith.constant 0 : index
    %13 = vector.load %arg1[%c0_11, %c0_12] : memref<64x64xbf16, #tpu.memory_space<vmem>>, vector<64x64xbf16>
    %c0_13 = arith.constant 0 : index
    %c0_14 = arith.constant 0 : index
    %14 = vector.load %arg7[%c0_13, %c0_14] : memref<64x128xbf16, #tpu.memory_space<vmem>>, vector<64x128xbf16>
    %cst_15 = arith.constant dense<0.000000e+00> : vector<64x128xf32>
    %15 = tpu.matmul %13, %14, %cst_15 {dimension_numbers = #tpu.dot_dimension_numbers<[1], [0], [0], [1], [0, 0, 1, 1], [], []>} : vector<64x64xbf16>, vector<64x128xbf16>, vector<64x128xf32> -> vector<64x128xf32>
    %c0_16 = arith.constant 0 : index
    %c0_17 = arith.constant 0 : index
    %16 = vector.load %arg5[%c0_16, %c0_17] : memref<1x128xf32, #tpu.memory_space<vmem>>, vector<1x128xf32>
    %17 = vector.broadcast %16 : vector<1x128xf32> to vector<64x128xf32>
    %18 = arith.addf %15, %17 : vector<64x128xf32>
    %c0_18 = arith.constant 0 : index
    %c0_19 = arith.constant 0 : index
    %19 = vector.load %arg6[%c0_18, %c0_19] : memref<64x128xf32, #tpu.memory_space<vmem>>, vector<64x128xf32>
    tpu.vector_store %arg6[%c0_18, %c0_19], %18 {strides = array<i32>} : memref<64x128xf32, #tpu.memory_space<vmem>>, vector<64x128xf32>,
    return
  }
  func.func @transform_0(%arg0: i32) -> (i32, i32) {
    %c0_i32 = arith.constant 0 : i32
    %c0_i32_0 = arith.constant 0 : i32
    %c0_i32_1 = arith.constant 0 : i32
    return %c0_i32, %c0_i32_0 : i32, i32
  }
  func.func @transform_1(%arg0: i32) -> (i32, i32) {
    %c0_i32 = arith.constant 0 : i32
    %c0_i32_0 = arith.constant 0 : i32
    %c0_i32_1 = arith.constant 0 : i32
    return %c0_i32, %c0_i32_0 : i32, i32
  }
  func.func @transform_2(%arg0: i32) -> (i32, i32) {
    %c0_i32 = arith.constant 0 : i32
    %c0_i32_0 = arith.constant 0 : i32
    %c0_i32_1 = arith.constant 0 : i32
    return %c0_i32, %c0_i32_0 : i32, i32
  }
  func.func @transform_3(%arg0: i32) -> (i32, i32) {
    %c0_i32 = arith.constant 0 : i32
    %c0_i32_0 = arith.constant 0 : i32
    %c0_i32_1 = arith.constant 0 : i32
    return %c0_i32, %c0_i32_0 : i32, i32
  }
  func.func @transform_4(%arg0: i32) -> (i32, i32) {
    %c0_i32 = arith.constant 0 : i32
    %c0_i32_0 = arith.constant 0 : i32
    %c0_i32_1 = arith.constant 0 : i32
    return %c0_i32, %c0_i32_0 : i32, i32
  }
  func.func @transform_5(%arg0: i32) -> (i32, i32) {
    %c0_i32 = arith.constant 0 : i32
    %c0_i32_0 = arith.constant 0 : i32
    %c0_i32_1 = arith.constant 0 : i32
    return %c0_i32, %c0_i32_0 : i32, i32
  }
}

module attributes {stable_mosaic.version = 11 : i64} {
  func.func @gcn_fused_kernel(%arg0: i32, %arg1: memref<64x64xbf16, #tpu.memory_space<vmem>>, %arg2: memref<64x32xbf16, #tpu.memory_space<vmem>>, %arg3: memref<1x32xf32, #tpu.memory_space<vmem>>, %arg4: memref<32x128xbf16, #tpu.memory_space<vmem>>, %arg5: memref<1x128xf32, #tpu.memory_space<vmem>>, %arg6: memref<64x128xf32, #tpu.memory_space<vmem>>, %arg7: memref<64x128xbf16, #tpu.memory_space<vmem>>) attributes {dimension_semantics = [#tpu.dimension_semantics<arbitrary>], iteration_bounds = array<i64: 1>, scalar_prefetch = 0 : i64, scratch_operands = 1 : i64, tpu.core_type = #tpu.core_type<tc>, window_params = [{pipeline_mode = #tpu.pipeline_mode<synchronous>, transform_indices = @transform_0, window_bounds = array<i64: 64, 64>}, {pipeline_mode = #tpu.pipeline_mode<synchronous>, transform_indices = @transform_1, window_bounds = array<i64: 64, 32>}, {pipeline_mode = #tpu.pipeline_mode<synchronous>, transform_indices = @transform_2, window_bounds = array<i64: 1, 32>}, {pipeline_mode = #tpu.pipeline_mode<synchronous>, transform_indices = @transform_3, window_bounds = array<i64: 32, 128>}, {pipeline_mode = #tpu.pipeline_mode<synchronous>, transform_indices = @transform_4, window_bounds = array<i64: 1, 128>}, {pipeline_mode = #tpu.pipeline_mode<synchronous>, transform_indices = @transform_5, window_bounds = array<i64: 64, 128>}]} {
    %c0 = arith.constant 0 : index
    %c0_0 = arith.constant 0 : index
    %0 = vector.load %arg1[%c0, %c0_0] : memref<64x64xbf16, #tpu.memory_space<vmem>>, vector<64x64xbf16>
    %c0_1 = arith.constant 0 : index
    %c0_2 = arith.constant 0 : index
    %1 = vector.load %arg2[%c0_1, %c0_2] : memref<64x32xbf16, #tpu.memory_space<vmem>>, vector<64x32xbf16>
    %cst = arith.constant dense<0.000000e+00> : vector<64x32xf32>
    %2 = tpu.matmul %0, %1, %cst {dimension_numbers = #tpu.dot_dimension_numbers<[1], [0], [0], [1], [0, 0, 1, 1], [], []>} : vector<64x64xbf16>, vector<64x32xbf16>, vector<64x32xf32> -> vector<64x32xf32>
    %c0_3 = arith.constant 0 : index
    %c0_4 = arith.constant 0 : index
    %3 = vector.load %arg3[%c0_3, %c0_4] : memref<1x32xf32, #tpu.memory_space<vmem>>, vector<1x32xf32>
    %4 = vector.broadcast %3 : vector<1x32xf32> to vector<64x32xf32>
    %5 = arith.addf %2, %4 : vector<64x32xf32>
    %cst_5 = arith.constant 0.000000e+00 : f32
    %6 = vector.broadcast %cst_5 : f32 to vector<64x32xf32>
    %7 = arith.maximumf %5, %6 : vector<64x32xf32>
    %8 = arith.truncf %7 : vector<64x32xf32> to vector<64x32xbf16>
    %c0_6 = arith.constant 0 : index
    %c0_7 = arith.constant 0 : index
    %9 = vector.load %arg4[%c0_6, %c0_7] : memref<32x128xbf16, #tpu.memory_space<vmem>>, vector<32x128xbf16>
    %cst_8 = arith.constant dense<0.000000e+00> : vector<64x128xf32>
    %10 = tpu.matmul %8, %9, %cst_8 {dimension_numbers = #tpu.dot_dimension_numbers<[1], [0], [0], [1], [0, 0, 1, 1], [], []>} : vector<64x32xbf16>, vector<32x128xbf16>, vector<64x128xf32> -> vector<64x128xf32>
    %11 = arith.truncf %10 : vector<64x128xf32> to vector<64x128xbf16>
    %c0_9 = arith.constant 0 : index
    %c0_10 = arith.constant 0 : index
    %12 = vector.load %arg7[%c0_9, %c0_10] : memref<64x128xbf16, #tpu.memory_space<vmem>>, vector<64x128xbf16>
    tpu.vector_store %arg7[%c0_9, %c0_10], %11 {strides = array<i32>} : memref<64x128xbf16, #tpu.memory_space<vmem>>, vector<64x128xbf16>,
    %c0_11 = arith.constant 0 : index
    %c0_12 = arith.constant 0 : index
    %13 = vector.load %arg1[%c0_11, %c0_12] : memref<64x64xbf16, #tpu.memory_space<vmem>>, vector<64x64xbf16>
    %c0_13 = arith.constant 0 : index
    %c0_14 = arith.constant 0 : index
    %14 = vector.load %arg7[%c0_13, %c0_14] : memref<64x128xbf16, #tpu.memory_space<vmem>>, vector<64x128xbf16>
    %cst_15 = arith.constant dense<0.000000e+00> : vector<64x128xf32>
    %15 = tpu.matmul %13, %14, %cst_15 {dimension_numbers = #tpu.dot_dimension_numbers<[1], [0], [0], [1], [0, 0, 1, 1], [], []>} : vector<64x64xbf16>, vector<64x128xbf16>, vector<64x128xf32> -> vector<64x128xf32>
    %c0_16 = arith.constant 0 : index
    %c0_17 = arith.constant 0 : index
    %16 = vector.load %arg5[%c0_16, %c0_17] : memref<1x128xf32, #tpu.memory_space<vmem>>, vector<1x128xf32>
    %17 = vector.broadcast %16 : vector<1x128xf32> to vector<64x128xf32>
    %18 = arith.addf %15, %17 : vector<64x128xf32>
    %c0_18 = arith.constant 0 : index
    %c0_19 = arith.constant 0 : index
    %19 = vector.load %arg6[%c0_18, %c0_19] : memref<64x128xf32, #tpu.memory_space<vmem>>, vector<64x128xf32>
    tpu.vector_store %arg6[%c0_18, %c0_19], %18 {strides = array<i32>} : memref<64x128xf32, #tpu.memory_space<vmem>>, vector<64x128xf32>,
    return
  }
  func.func @transform_0(%arg0: i32) -> (i32, i32) {
    %c0_i32 = arith.constant 0 : i32
    %c0_i32_0 = arith.constant 0 : i32
    %c0_i32_1 = arith.constant 0 : i32
    return %c0_i32, %c0_i32_0 : i32, i32
  }
  func.func @transform_1(%arg0: i32) -> (i32, i32) {
    %c0_i32 = arith.constant 0 : i32
    %c0_i32_0 = arith.constant 0 : i32
    %c0_i32_1 = arith.constant 0 : i32
    return %c0_i32, %c0_i32_0 : i32, i32
  }
  func.func @transform_2(%arg0: i32) -> (i32, i32) {
    %c0_i32 = arith.constant 0 : i32
    %c0_i32_0 = arith.constant 0 : i32
    %c0_i32_1 = arith.constant 0 : i32
    return %c0_i32, %c0_i32_0 : i32, i32
  }
  func.func @transform_3(%arg0: i32) -> (i32, i32) {
    %c0_i32 = arith.constant 0 : i32
    %c0_i32_0 = arith.constant 0 : i32
    %c0_i32_1 = arith.constant 0 : i32
    return %c0_i32, %c0_i32_0 : i32, i32
  }
  func.func @transform_4(%arg0: i32) -> (i32, i32) {
    %c0_i32 = arith.constant 0 : i32
    %c0_i32_0 = arith.constant 0 : i32
    %c0_i32_1 = arith.constant 0 : i32
    return %c0_i32, %c0_i32_0 : i32, i32
  }
  func.func @transform_5(%arg0: i32) -> (i32, i32) {
    %c0_i32 = arith.constant 0 : i32
    %c0_i32_0 = arith.constant 0 : i32
    %c0_i32_1 = arith.constant 0 : i32
    return %c0_i32, %c0_i32_0 : i32, i32
  }
}

</mosaic_0001>

<bundles_post_ra>
// kernel: tpu_custom_call.1
= control target key start
LH: loop header
LB: loop body
LE: loop exit
PB: predicated region body
PF: predicated region fallthrough
CT: control target
= control target key end

     0   :  { %vm89_vm0 = vcmask 523264   ;;  %s757_s0 = inlined_call_operand.vmem [shape: bf16[64,64], index: 0, kind: input, shape index: {}]   ;;  %s758_s1 = inlined_call_operand.vmem [shape: bf16[64,32], index: 1, kind: input, shape index: {}]   ;;  %s759_s2 = inlined_call_operand.vmem [shape: f32[1,32], index: 2, kind: input, shape index: {}]   ;;  %s760_s3 = inlined_call_operand.vmem [shape: bf16[32,128], index: 3, kind: input, shape index: {}]   ;;  %s761_s4 = inlined_call_operand.vmem [shape: f32[1,128], index: 4, kind: input, shape index: {}]   ;;  %s762_s5 = inlined_call_operand.hbm [shape: f32[64,128], index: 5, kind: output, shape index: {}]  }
   0x1   :  { %v621_v0 = vld [vmem:[%s758_s1 + $0x18] sm:$0xff]   ;;  %v622_v1 = vld [vmem:[%s758_s1 + $0x10] sm:$0xff]   ;;  %v623_v2 = vld [vmem:[%s758_s1 + $0x8] sm:$0xff]  }
   0x2   :  { %574 = vmatprep.subr.bf16.mxu0 %v621_v0  ;;  %v625_v3 = vld [vmem:[%s757_s0] sm:$0xff]  }
   0x3   :  { %575 = vmatpush3.bf16.msra.mxu0 %v621_v0  ;;  %582 = vmatprep.mubr.msk.bf16.mxu0 %vm89_vm0, %v625_v3  ;;  %v624_v4 = vld [vmem:[%s758_s1] sm:$0xff]  }
   0x4   :  { %576 = vmatprep.subr.bf16.mxu0 %v622_v1 }
   0x7   :  { %577 = vmatpush3.bf16.msra.mxu0 %v622_v1 }
   0x8   :  { %578 = vmatprep.subr.bf16.mxu0 %v623_v2 }
   0xb   :  { %579 = vmatpush3.bf16.msra.mxu0 %v623_v2 }
   0xc   :  { %580 = vmatprep.subr.bf16.mxu0 %v624_v4 }
   0xd   :  { %10 = vsyncpa [#allocation4], 0  ;;  %v626_v5 = vld [vmem:[%s757_s0 + $0x8] sm:$0xff]   ;;  %v627_v6 = vld [vmem:[%s757_s0 + $0x10] sm:$0xff]   ;;  %vm195_vm1 = vcmask 261120  }
   0xe   :  { %v628_v7 = vld [vmem:[%s757_s0 + $0x18] sm:$0xff]   ;;  %v629_v8 = vld [vmem:[%s760_s3 + $0x8] sm:$0xff]   ;;  %v630_v9 = vld [vmem:[%s760_s3] sm:$0xff]  }
   0xf   :  { %581 = vmatpush3.bf16.msra.mxu0 %v624_v4  ;;  %590 = vmatprep.subr.bf16.mxu1 %v629_v8  ;;  %v481_v12 = vld [vmem:[%s759_s2] ss:$0 sm:$0xff]  ;;  %v636_v56 = vld [vmem:[%s757_s0 + $0x8] sm:$0xff]   ;;  %v637_v57 = vld [vmem:[%s757_s0 + $0x10] sm:$0xff]  }
  0x10   :  { %591 = vmatpush3.bf16.msra.mxu1 %v629_v8  ;;  %v635_v39 = vld [vmem:[%s757_s0] sm:$0xff]   ;;  %v638_v58 = vld [vmem:[%s757_s0 + $0x18] sm:$0xff]   ;;  %s661_s0 = smov [#allocation3]  }
  0x11   :  { %592 = vmatprep.subr.bf16.mxu1 %v630_v9  ;;  %v508_v59 = vld [vmem:[%s761_s4] ss:$0 sm:$0xff]  ;;  %s470_s22 = sshll.u32 %s661_s0, 4  ;;  %s471_s22 = int_to_ptr.vmem [resolvable:$true] %s470_s22 }
  0x12   :  { %583 = vmatmul.mubr.msk.bf16.vlgmr.msra.gmra.mxu0 %vm89_vm0, %v626_v5  ;;  %s639_s4 = scalar_lea.vmem %s471_s22, 1024  ;;  %p644_p1 = scmp.lt.s32.totalorder %s471_s22, %s471_s22 }
  0x13   :  { %586 = vmatprep.mubr.msk.bf16.mxu0 %vm89_vm0, %v627_v6  ;;  %p640_p0 = scmp.ne.s32.totalorder %s471_s22, %s639_s4  ;;  %p645_p2 = scmp.lt.s32.totalorder %s639_s4, %s639_s4 }
  0x14   :  { %593 = vmatpush3.bf16.msra.mxu1 %v630_v9 }
  0x15   :  { %p646_p3 = por %p645_p2, %p644_p1 }
  0x17   :  { %p647_p4 = pnand %p646_p3, %p640_p0 }
  0x1a   :  { %587 = vmatmul.mubr.msk.bf16.gmra.mxu0 %vm89_vm0, %v628_v7 }
  0xd2   :  { %v584_v10 = vpop.f32.mrf.mxu0 }
  0xd3   :  { %v145_v16 = vadd.f32 %v584_v10, %v481_v12 }
  0xd4   :  { %v136_v11 = vpop.f32.mrf.mxu0 }
  0xd5   :  { %v137_v14 = vadd.f32 %v481_v12, %v136_v11  ;;  %v169_v23 = vmax.f32 %v145_v16, 0.0 }
  0xd6   :  { %v585_v13 = vpop.f32.mrf.mxu0 }
  0xd7   :  { %v148_v15 = vadd.f32 %v585_v13, %v481_v12  ;;  %v167_v21 = vmax.f32 %v137_v14, 0.0 }
  0xd8   :  { %v139_v17 = vpop.f32.mrf.mxu0 }
  0xd9   :  { %v140_v18 = vadd.f32 %v481_v12, %v139_v17  ;;  %v170_v19 = vmax.f32 %v148_v15, 0.0 }
  0xda   :  { %v588_v20 = vpop.f32.mrf.mxu0 }
  0xdb   :  { %v168_v22 = vmax.f32 %v140_v18, 0.0  ;;  %v176_v26 = vpack.c.bf16 %v170_v19, %v169_v23  ;;  %v161_v30 = vadd.f32 %v588_v20, %v481_v12 }
  0xdc   :  { %v152_v24 = vpop.f32.mrf.mxu0 }
  0xdd   :  { %v175_v25 = vpack.c.bf16 %v168_v22, %v167_v21  ;;  %v153_v28 = vadd.f32 %v481_v12, %v152_v24  ;;  %v173_v36 = vmax.f32 %v161_v30, 0.0 }
  0xde   :  { %v589_v27 = vpop.f32.mrf.mxu0 }
  0xdf   :  { %v164_v29 = vadd.f32 %v589_v27, %v481_v12  ;;  %594 = vmatprep.mubr.msk.bf16.mxu1 %vm195_vm1, %v175_v25  ;;  %v171_v34 = vmax.f32 %v153_v28, 0.0 }
  0xe0   :  { %v155_v31 = vpop.f32.mrf.mxu0  ;;  %595 = vmatmul.mubr.msk.bf16.vlgmr.msra.gmra.mxu1 %vm195_vm1, %v176_v26 }
  0xe1   :  { %v156_v32 = vadd.f32 %v481_v12, %v155_v31  ;;  %v174_v33 = vmax.f32 %v164_v29, 0.0 }
  0xe3   :  { %v172_v35 = vmax.f32 %v156_v32, 0.0  ;;  %v178_v38 = vpack.c.bf16 %v174_v33, %v173_v36 }
  0xe5   :  { %v177_v37 = vpack.c.bf16 %v172_v35, %v171_v34 }
  0xe7   :  { %598 = vmatprep.mubr.msk.bf16.mxu1 %vm195_vm1, %v177_v37 }
  0xe8   :  { %599 = vmatmul.mubr.msk.bf16.gmra.mxu1 %vm195_vm1, %v178_v38 }
  0xe9   :  { %610 = vmatprep.mubr.msk.bf16.mxu1 %vm89_vm0, %v635_v39 }
 0x1a0   :  { %v596_v40 = vpop.f32.mrf.mxu1 }
 0x1a2   :  { %v242_v41 = vpop.f32.mrf.mxu1 }
 0x1a4   :  { %v597_v42 = vpop.f32.mrf.mxu1 }
 0x1a5   :  { %v537_v43 = vpack.c.bf16 %v597_v42, %v596_v40 }
 0x1a6   :  { %v245_v44 = vpop.f32.mrf.mxu1 }
 0x1a7   :  { %549 = vst [vmem:[#allocation2 + $0x8] sm:$0xff] %v537_v43   ;;  %v532_v45 = vpack.c.bf16 %v245_v44, %v242_v41 }
 0x1a8   :  { %v600_v46 = vpop.f32.mrf.mxu1 }
 0x1a9   :  { %533 = vst [vmem:[#allocation2] sm:$0xff] %v532_v45  }
 0x1aa   :  { %v258_v47 = vpop.f32.mrf.mxu1 }
 0x1ac   :  { %v601_v48 = vpop.f32.mrf.mxu1 }
 0x1ad   :  { %v547_v49 = vpack.c.bf16 %v601_v48, %v600_v46 }
 0x1ae   :  { %v261_v50 = vpop.f32.mrf.mxu1  ;;  %v633_v54 = vld [vmem:[#allocation2 + $0x8] sm:$0xff]  }
 0x1af   :  { %551 = vst [vmem:[#allocation2 + $0x18] sm:$0xff] %v547_v49   ;;  %v542_v51 = vpack.c.bf16 %v261_v50, %v258_v47 }
 0x1b0   :  { %v634_v55 = vld [vmem:[#allocation2] sm:$0xff]  }
 0x1b1   :  { %550 = vst [vmem:[#allocation2 + $0x10] sm:$0xff] %v542_v51  }
 0x1b6   :  { %v631_v52 = vld [vmem:[#allocation2 + $0x18] sm:$0xff]  }
 0x1b7   :  { %602 = vmatprep.subr.bf16.mxu1 %v631_v52 }
 0x1b8   :  { %v632_v53 = vld [vmem:[#allocation2 + $0x10] sm:$0xff]   ;;  %603 = vmatpush3.bf16.msra.mxu1 %v631_v52 }
 0x1b9   :  { %604 = vmatprep.subr.bf16.mxu1 %v632_v53 }
 0x1bc   :  { %605 = vmatpush3.bf16.msra.mxu1 %v632_v53 }
 0x1bd   :  { %606 = vmatprep.subr.bf16.mxu1 %v633_v54 }
 0x1c0   :  { %607 = vmatpush3.bf16.msra.mxu1 %v633_v54 }
 0x1c1   :  { %608 = vmatprep.subr.bf16.mxu1 %v634_v55 }
 0x1c4   :  { %609 = vmatpush3.bf16.msra.mxu1 %v634_v55 }
 0x1c7   :  { %611 = vmatmul.mubr.msk.bf16.vlgmr.msra.gmra.mxu1 %vm89_vm0, %v636_v56 }
 0x1c8   :  { %614 = vmatprep.mubr.msk.bf16.mxu1 %vm89_vm0, %v637_v57 }
 0x1cf   :  { %615 = vmatmul.mubr.msk.bf16.gmra.mxu1 %vm89_vm0, %v638_v58 }
 0x287   :  { %v612_v60 = vpop.f32.mrf.mxu1 }
 0x288   :  { %v435_v61 = vadd.f32 %v612_v60, %v508_v59 }
 0x289   :  { %v426_v62 = vpop.f32.mrf.mxu1 }
 0x28a   :  { %459 = vst [vmem:[#allocation3 + $0x10] sm:$0xff] %v435_v61  ;;  %v427_v63 = vadd.f32 %v508_v59, %v426_v62 }
 0x28b   :  { %v613_v0 = vpop.f32.mrf.mxu1 }
 0x28c   :  { %457 = vst [vmem:[#allocation3] sm:$0xff] %v427_v63  ;;  %v438_v1 = vadd.f32 %v613_v0, %v508_v59 }
 0x28d   :  { %v429_v2 = vpop.f32.mrf.mxu1 }
 0x28e   :  { %460 = vst [vmem:[#allocation3 + $0x18] sm:$0xff] %v438_v1  ;;  %v430_v3 = vadd.f32 %v508_v59, %v429_v2 }
 0x28f   :  { %v616_v4 = vpop.f32.mrf.mxu1 }
 0x290   :  { %458 = vst [vmem:[#allocation3 + $0x8] sm:$0xff] %v430_v3  ;;  %v451_v5 = vadd.f32 %v616_v4, %v508_v59 }
 0x291   :  { %v442_v6 = vpop.f32.mrf.mxu1 }
 0x292   :  { %463 = vst [vmem:[#allocation3 + $0x30] sm:$0xff] %v451_v5  ;;  %v443_v7 = vadd.f32 %v508_v59, %v442_v6 }
 0x293   :  { %v617_v8 = vpop.f32.mrf.mxu1 }
 0x294   :  { %461 = vst [vmem:[#allocation3 + $0x20] sm:$0xff] %v443_v7  ;;  %v454_v9 = vadd.f32 %v617_v8, %v508_v59 }
 0x295   :  { %v445_v10 = vpop.f32.mrf.mxu1 }
 0x296   :  { %464 = vst [vmem:[#allocation3 + $0x38] sm:$0xff] %v454_v9  ;;  %v446_v11 = vadd.f32 %v508_v59, %v445_v10 }
 0x298   :  { %462 = vst [vmem:[#allocation3 + $0x28] sm:$0xff] %v446_v11 }
 0x299   :  { %650 = shalt.err (!%p647_p4)
}
 0x29a   :  { %s662_s23 = smov 128   ;;  %s663_s24 = smov 8  }
 0x29b   :  { %476 = dma.vmem_to_hbm [thread:$0]  %s471_s22, 1024, %s762_s5, [#allocation4], %s662_s23, %s662_s23, %s663_s24  }
 0x29c   :  { %659 = dma.done.wait [#allocation4], 1024  }
 0x29d   :  { %660 = vsyncadd [#allocation4], 4294966272 }
 0x29e   :  { %480 = vsyncpa [#allocation4], 1 }

// kernel: tpu_custom_call.1
= control target key start
LH: loop header
LB: loop body
LE: loop exit
PB: predicated region body
PF: predicated region fallthrough
CT: control target
= control target key end

     0   :  { %vm89_vm0 = vcmask 523264   ;;  %s757_s0 = inlined_call_operand.vmem [shape: bf16[64,64], index: 0, kind: input, shape index: {}]   ;;  %s758_s1 = inlined_call_operand.vmem [shape: bf16[64,32], index: 1, kind: input, shape index: {}]   ;;  %s759_s2 = inlined_call_operand.vmem [shape: f32[1,32], index: 2, kind: input, shape index: {}]   ;;  %s760_s3 = inlined_call_operand.vmem [shape: bf16[32,128], index: 3, kind: input, shape index: {}]   ;;  %s761_s4 = inlined_call_operand.vmem [shape: f32[1,128], index: 4, kind: input, shape index: {}]   ;;  %s762_s5 = inlined_call_operand.hbm [shape: f32[64,128], index: 5, kind: output, shape index: {}]  }
   0x1   :  { %v621_v0 = vld [vmem:[%s758_s1 + $0x18] sm:$0xff]   ;;  %v622_v1 = vld [vmem:[%s758_s1 + $0x10] sm:$0xff]   ;;  %v623_v2 = vld [vmem:[%s758_s1 + $0x8] sm:$0xff]  }
   0x2   :  { %574 = vmatprep.subr.bf16.mxu0 %v621_v0  ;;  %v625_v3 = vld [vmem:[%s757_s0] sm:$0xff]  }
   0x3   :  { %575 = vmatpush3.bf16.msra.mxu0 %v621_v0  ;;  %582 = vmatprep.mubr.msk.bf16.mxu0 %vm89_vm0, %v625_v3  ;;  %v624_v4 = vld [vmem:[%s758_s1] sm:$0xff]  }
   0x4   :  { %576 = vmatprep.subr.bf16.mxu0 %v622_v1 }
   0x7   :  { %577 = vmatpush3.bf16.msra.mxu0 %v622_v1 }
   0x8   :  { %578 = vmatprep.subr.bf16.mxu0 %v623_v2 }
   0xb   :  { %579 = vmatpush3.bf16.msra.mxu0 %v623_v2 }
   0xc   :  { %580 = vmatprep.subr.bf16.mxu0 %v624_v4 }
   0xd   :  { %10 = vsyncpa [#allocation4], 0  ;;  %v626_v5 = vld [vmem:[%s757_s0 + $0x8] sm:$0xff]   ;;  %v627_v6 = vld [vmem:[%s757_s0 + $0x10] sm:$0xff]   ;;  %vm195_vm1 = vcmask 261120  }
   0xe   :  { %v628_v7 = vld [vmem:[%s757_s0 + $0x18] sm:$0xff]   ;;  %v629_v8 = vld [vmem:[%s760_s3 + $0x8] sm:$0xff]   ;;  %v630_v9 = vld [vmem:[%s760_s3] sm:$0xff]  }
   0xf   :  { %581 = vmatpush3.bf16.msra.mxu0 %v624_v4  ;;  %590 = vmatprep.subr.bf16.mxu1 %v629_v8  ;;  %v481_v12 = vld [vmem:[%s759_s2] ss:$0 sm:$0xff]  ;;  %v636_v56 = vld [vmem:[%s757_s0 + $0x8] sm:$0xff]   ;;  %v637_v57 = vld [vmem:[%s757_s0 + $0x10] sm:$0xff]  }
  0x10   :  { %591 = vmatpush3.bf16.msra.mxu1 %v629_v8  ;;  %v635_v39 = vld [vmem:[%s757_s0] sm:$0xff]   ;;  %v638_v58 = vld [vmem:[%s757_s0 + $0x18] sm:$0xff]   ;;  %s661_s0 = smov [#allocation3]  }
  0x11   :  { %592 = vmatprep.subr.bf16.mxu1 %v630_v9  ;;  %v508_v59 = vld [vmem:[%s761_s4] ss:$0 sm:$0xff]  ;;  %s470_s22 = sshll.u32 %s661_s0, 4  ;;  %s471_s22 = int_to_ptr.vmem [resolvable:$true] %s470_s22 }
  0x12   :  { %583 = vmatmul.mubr.msk.bf16.vlgmr.msra.gmra.mxu0 %vm89_vm0, %v626_v5  ;;  %s639_s4 = scalar_lea.vmem %s471_s22, 1024  ;;  %p644_p1 = scmp.lt.s32.totalorder %s471_s22, %s471_s22 }
  0x13   :  { %586 = vmatprep.mubr.msk.bf16.mxu0 %vm89_vm0, %v627_v6  ;;  %p640_p0 = scmp.ne.s32.totalorder %s471_s22, %s639_s4  ;;  %p645_p2 = scmp.lt.s32.totalorder %s639_s4, %s639_s4 }
  0x14   :  { %593 = vmatpush3.bf16.msra.mxu1 %v630_v9 }
  0x15   :  { %p646_p3 = por %p645_p2, %p644_p1 }
  0x17   :  { %p647_p4 = pnand %p646_p3, %p640_p0 }
  0x1a   :  { %587 = vmatmul.mubr.msk.bf16.gmra.mxu0 %vm89_vm0, %v628_v7 }
  0xd2   :  { %v584_v10 = vpop.f32.mrf.mxu0 }
  0xd3   :  { %v145_v16 = vadd.f32 %v584_v10, %v481_v12 }
  0xd4   :  { %v136_v11 = vpop.f32.mrf.mxu0 }
  0xd5   :  { %v137_v14 = vadd.f32 %v481_v12, %v136_v11  ;;  %v169_v23 = vmax.f32 %v145_v16, 0.0 }
  0xd6   :  { %v585_v13 = vpop.f32.mrf.mxu0 }
  0xd7   :  { %v148_v15 = vadd.f32 %v585_v13, %v481_v12  ;;  %v167_v21 = vmax.f32 %v137_v14, 0.0 }
  0xd8   :  { %v139_v17 = vpop.f32.mrf.mxu0 }
  0xd9   :  { %v140_v18 = vadd.f32 %v481_v12, %v139_v17  ;;  %v170_v19 = vmax.f32 %v148_v15, 0.0 }
  0xda   :  { %v588_v20 = vpop.f32.mrf.mxu0 }
  0xdb   :  { %v168_v22 = vmax.f32 %v140_v18, 0.0  ;;  %v176_v26 = vpack.c.bf16 %v170_v19, %v169_v23  ;;  %v161_v30 = vadd.f32 %v588_v20, %v481_v12 }
  0xdc   :  { %v152_v24 = vpop.f32.mrf.mxu0 }
  0xdd   :  { %v175_v25 = vpack.c.bf16 %v168_v22, %v167_v21  ;;  %v153_v28 = vadd.f32 %v481_v12, %v152_v24  ;;  %v173_v36 = vmax.f32 %v161_v30, 0.0 }
  0xde   :  { %v589_v27 = vpop.f32.mrf.mxu0 }
  0xdf   :  { %v164_v29 = vadd.f32 %v589_v27, %v481_v12  ;;  %594 = vmatprep.mubr.msk.bf16.mxu1 %vm195_vm1, %v175_v25  ;;  %v171_v34 = vmax.f32 %v153_v28, 0.0 }
  0xe0   :  { %v155_v31 = vpop.f32.mrf.mxu0  ;;  %595 = vmatmul.mubr.msk.bf16.vlgmr.msra.gmra.mxu1 %vm195_vm1, %v176_v26 }
  0xe1   :  { %v156_v32 = vadd.f32 %v481_v12, %v155_v31  ;;  %v174_v33 = vmax.f32 %v164_v29, 0.0 }
  0xe3   :  { %v172_v35 = vmax.f32 %v156_v32, 0.0  ;;  %v178_v38 = vpack.c.bf16 %v174_v33, %v173_v36 }
  0xe5   :  { %v177_v37 = vpack.c.bf16 %v172_v35, %v171_v34 }
  0xe7   :  { %598 = vmatprep.mubr.msk.bf16.mxu1 %vm195_vm1, %v177_v37 }
  0xe8   :  { %599 = vmatmul.mubr.msk.bf16.gmra.mxu1 %vm195_vm1, %v178_v38 }
  0xe9   :  { %610 = vmatprep.mubr.msk.bf16.mxu1 %vm89_vm0, %v635_v39 }
 0x1a0   :  { %v596_v40 = vpop.f32.mrf.mxu1 }
 0x1a2   :  { %v242_v41 = vpop.f32.mrf.mxu1 }
 0x1a4   :  { %v597_v42 = vpop.f32.mrf.mxu1 }
 0x1a5   :  { %v537_v43 = vpack.c.bf16 %v597_v42, %v596_v40 }
 0x1a6   :  { %v245_v44 = vpop.f32.mrf.mxu1 }
 0x1a7   :  { %549 = vst [vmem:[#allocation2 + $0x8] sm:$0xff] %v537_v43   ;;  %v532_v45 = vpack.c.bf16 %v245_v44, %v242_v41 }
 0x1a8   :  { %v600_v46 = vpop.f32.mrf.mxu1 }
 0x1a9   :  { %533 = vst [vmem:[#allocation2] sm:$0xff] %v532_v45  }
 0x1aa   :  { %v258_v47 = vpop.f32.mrf.mxu1 }
 0x1ac   :  { %v601_v48 = vpop.f32.mrf.mxu1 }
 0x1ad   :  { %v547_v49 = vpack.c.bf16 %v601_v48, %v600_v46 }
 0x1ae   :  { %v261_v50 = vpop.f32.mrf.mxu1  ;;  %v633_v54 = vld [vmem:[#allocation2 + $0x8] sm:$0xff]  }
 0x1af   :  { %551 = vst [vmem:[#allocation2 + $0x18] sm:$0xff] %v547_v49   ;;  %v542_v51 = vpack.c.bf16 %v261_v50, %v258_v47 }
 0x1b0   :  { %v634_v55 = vld [vmem:[#allocation2] sm:$0xff]  }
 0x1b1   :  { %550 = vst [vmem:[#allocation2 + $0x10] sm:$0xff] %v542_v51  }
 0x1b6   :  { %v631_v52 = vld [vmem:[#allocation2 + $0x18] sm:$0xff]  }
 0x1b7   :  { %602 = vmatprep.subr.bf16.mxu1 %v631_v52 }
 0x1b8   :  { %v632_v53 = vld [vmem:[#allocation2 + $0x10] sm:$0xff]   ;;  %603 = vmatpush3.bf16.msra.mxu1 %v631_v52 }
 0x1b9   :  { %604 = vmatprep.subr.bf16.mxu1 %v632_v53 }
 0x1bc   :  { %605 = vmatpush3.bf16.msra.mxu1 %v632_v53 }
 0x1bd   :  { %606 = vmatprep.subr.bf16.mxu1 %v633_v54 }
 0x1c0   :  { %607 = vmatpush3.bf16.msra.mxu1 %v633_v54 }
 0x1c1   :  { %608 = vmatprep.subr.bf16.mxu1 %v634_v55 }
 0x1c4   :  { %609 = vmatpush3.bf16.msra.mxu1 %v634_v55 }
 0x1c7   :  { %611 = vmatmul.mubr.msk.bf16.vlgmr.msra.gmra.mxu1 %vm89_vm0, %v636_v56 }
 0x1c8   :  { %614 = vmatprep.mubr.msk.bf16.mxu1 %vm89_vm0, %v637_v57 }
 0x1cf   :  { %615 = vmatmul.mubr.msk.bf16.gmra.mxu1 %vm89_vm0, %v638_v58 }
 0x287   :  { %v612_v60 = vpop.f32.mrf.mxu1 }
 0x288   :  { %v435_v61 = vadd.f32 %v612_v60, %v508_v59 }
 0x289   :  { %v426_v62 = vpop.f32.mrf.mxu1 }
 0x28a   :  { %459 = vst [vmem:[#allocation3 + $0x10] sm:$0xff] %v435_v61  ;;  %v427_v63 = vadd.f32 %v508_v59, %v426_v62 }
 0x28b   :  { %v613_v0 = vpop.f32.mrf.mxu1 }
 0x28c   :  { %457 = vst [vmem:[#allocation3] sm:$0xff] %v427_v63  ;;  %v438_v1 = vadd.f32 %v613_v0, %v508_v59 }
 0x28d   :  { %v429_v2 = vpop.f32.mrf.mxu1 }
 0x28e   :  { %460 = vst [vmem:[#allocation3 + $0x18] sm:$0xff] %v438_v1  ;;  %v430_v3 = vadd.f32 %v508_v59, %v429_v2 }
 0x28f   :  { %v616_v4 = vpop.f32.mrf.mxu1 }
 0x290   :  { %458 = vst [vmem:[#allocation3 + $0x8] sm:$0xff] %v430_v3  ;;  %v451_v5 = vadd.f32 %v616_v4, %v508_v59 }
 0x291   :  { %v442_v6 = vpop.f32.mrf.mxu1 }
 0x292   :  { %463 = vst [vmem:[#allocation3 + $0x30] sm:$0xff] %v451_v5  ;;  %v443_v7 = vadd.f32 %v508_v59, %v442_v6 }
 0x293   :  { %v617_v8 = vpop.f32.mrf.mxu1 }
 0x294   :  { %461 = vst [vmem:[#allocation3 + $0x20] sm:$0xff] %v443_v7  ;;  %v454_v9 = vadd.f32 %v617_v8, %v508_v59 }
 0x295   :  { %v445_v10 = vpop.f32.mrf.mxu1 }
 0x296   :  { %464 = vst [vmem:[#allocation3 + $0x38] sm:$0xff] %v454_v9  ;;  %v446_v11 = vadd.f32 %v508_v59, %v445_v10 }
 0x298   :  { %462 = vst [vmem:[#allocation3 + $0x28] sm:$0xff] %v446_v11 }
 0x299   :  { %650 = shalt.err (!%p647_p4)
}
 0x29a   :  { %s662_s23 = smov 128   ;;  %s663_s24 = smov 8  }
 0x29b   :  { %476 = dma.vmem_to_hbm [thread:$0]  %s471_s22, 1024, %s762_s5, [#allocation4], %s662_s23, %s662_s23, %s663_s24  }
 0x29c   :  { %659 = dma.done.wait [#allocation4], 1024  }
 0x29d   :  { %660 = vsyncadd [#allocation4], 4294966272 }
 0x29e   :  { %480 = vsyncpa [#allocation4], 1 }

</bundles_post_ra>
